<compile_context>
chip_gen: v7x
topology: tpu7x:2x2x1
jax: 0.10.0
libtpu: 0.0.40
codegen_flags: <defaults>
</compile_context>

<pallas_src>
import functools

import jax
import jax.numpy as jnp
from jax.experimental import pallas as pl
from jax.experimental.pallas import tpu as pltpu


# ----------------------------- tiling / budgeting helpers -----------------------------

def _physical_vmem_bytes():
    try:
        cap = getattr(pltpu.get_tpu_info(), "vmem_capacity_bytes", None)
        if cap:
            return int(cap)
    except Exception:
        pass
    return 64 << 20  # conservative fallback: v7x per-TensorCore VMEM


def _vmem_limit_bytes():
    # v5e/v6e (128 MiB physical) -> 96 MiB scoped; v7x (64 MiB) -> 48 MiB scoped.
    return int(min(_physical_vmem_bytes() * 3 // 4, 96 << 20))


def _sublane_multiple(dtype):
    # f32 -> 8, bf16/f16 -> 16, int8/fp8 -> 32 row sublane tiles (unmasked stores).
    return max(8, 32 // jnp.dtype(dtype).itemsize)


def _pick_batch_tile(batch, n, n_padded, nk, itemsize, sublane, vmem_limit_bytes,
                     io_block_target_bytes=2 << 20):
    # Per-row VMEM footprint estimate:
    #   input block (double-buffered)          : 2 * n * itemsize
    #   2*nk output blocks (double-buffered)   : 4 * nk * n * itemsize
    #   padded f32 scratch                     : n_padded * 4
    #   live f32 temporaries (doubling pyramid): ~8 * n_padded * 4
    per_row = (2 * n * itemsize
               + 4 * nk * n * itemsize
               + n_padded * 4
               + 8 * n_padded * 4)
    bt_vmem = max(1, (vmem_limit_bytes // 2) // per_row)          # keep 2x headroom
    bt_io = max(1, io_block_target_bytes // max(1, n * itemsize))  # ~2 MiB input block
    bt = min(batch, bt_vmem, bt_io)
    if bt < batch:
        bt = max(sublane, (bt // sublane) * sublane)
    # Prefer >= 2 grid steps (v7x has 2 TensorCores; also gives the pipeline depth).
    if bt >= batch and batch >= 2 * sublane:
        half = -(-batch // 2)
        bt = min(batch, -(-half // sublane) * sublane)
    return bt


# ----------------------------------- kernel body -----------------------------------

def _window_sum_from_padded(xp, k, step):
    """Windowed sum of width `k` with lane-stride `step` over a zero-padded slab.

    xp: (Bt, Np) float32 where Np = N + (k-1)*step.
    Returns (Bt, N) with out[:, i] = sum_{j=0}^{k-1} xp[:, i + j*step].
    Binary doubling: ~2*log2(k) adds with static lane slices only.
    """
    acc, width = None, 0
    pw, p = xp, 1
    kk = k
    while True:
        if kk & 1:
            if acc is None:
                acc, width = pw, p
            else:
                newlen = pw.shape[-1] - width * step
                acc = acc[:, :newlen] + pw[:, width * step:]
                width += p
        kk >>= 1
        if kk == 0:
            break
        newlen = pw.shape[-1] - p * step
        pw = pw[:, :newlen] + pw[:, p * step:]
        p *= 2
    assert width == k
    return acc


def _fused_decomp_kernel(x_ref, *refs, kernel_sizes, channels, max_halo):
    """One block of the fused multi-scale decomposition.

    x_ref : (bt, N) with N = L*C (time and channels flattened onto lanes).
    refs  : res_0, mean_0, res_1, mean_1, ..., [xp_scratch]  (each (bt, N)).
    """
    nk = len(kernel_sizes)
    out_refs = refs[:2 * nk]
    xp_ref = refs[2 * nk] if max_halo > 0 else None

    bt, n = x_ref.shape
    cur = x_ref[...].astype(jnp.float32)  # single hoisted upcast

    if max_halo > 0:
        # Zero both halo strips once per block; the interior is rewritten per scale
        # and the halos are never touched again.  (AvgPool1d zero-pads and, with
        # count_include_pad=True, divides by k.)
        zeros_halo = jnp.zeros((bt, max_halo), jnp.float32)
        xp_ref[:, :max_halo] = zeros_halo
        xp_ref[:, max_halo + n:] = zeros_halo

    for ki, k in enumerate(kernel_sizes):
        res_ref = out_refs[2 * ki]
        mean_ref = out_refs[2 * ki + 1]
        halo = ((k - 1) // 2) * channels
        if halo == 0:
            mean_f = cur  # k == 1: moving average is the identity
        else:
            # TODO(synk): for the first scale with an f32 input this interior store
            # could instead be a local DMA (pltpu.sync_copy) straight from x_ref.
            xp_ref[:, max_halo:max_halo + n] = cur
            xp = xp_ref[:, max_halo - halo: max_halo + n + halo]
            mean_f = _window_sum_from_padded(xp, k, channels) * (1.0 / k)
        res_ref[...] = (cur - mean_f).astype(res_ref.dtype)
        mean_ref[...] = mean_f.astype(mean_ref.dtype)
        cur = mean_f  # next scale decomposes this trend


# --------------------------------- pallas_call wrapper ---------------------------------

def multi_scale_series_decomp(x, kernel_sizes):
    """Fused series_decomp over all scales, trend of scale i feeding scale i+1.

    x: (B, L, C).  Returns (res_list, mean_list) of (B, L, C) arrays per scale.
    """
    kernel_sizes = tuple(int(k) for k in kernel_sizes)
    for k in kernel_sizes:
        if k < 1 or k % 2 == 0:
            raise ValueError("series_decomp requires an odd kernel_size >= 1")
    b, l, c = x.shape
    n = l * c
    nk = len(kernel_sizes)
    max_halo = max((k - 1) // 2 for k in kernel_sizes) * c
    n_padded = n + 2 * max_halo

    x2 = x.reshape(b, n)  # free layout change: lane-dense blocks

    itemsize = jnp.dtype(x.dtype).itemsize
    sublane = _sublane_multiple(x.dtype)
    vmem_limit = _vmem_limit_bytes()
    bt = _pick_batch_tile(b, n, n_padded, nk, itemsize, sublane, vmem_limit)
    grid = (pl.cdiv(b, bt),)

    io_spec = pl.BlockSpec((bt, n), lambda i: (i, 0))
    out_shapes = tuple(jax.ShapeDtypeStruct((b, n), x.dtype) for _ in range(2 * nk))
    out_specs = tuple(io_spec for _ in range(2 * nk))
    scratch = [pltpu.VMEM((bt, n_padded), jnp.float32)] if max_halo > 0 else []

    flops = sum(2 * max(1, k.bit_length()) + 2 for k in kernel_sizes) * b * n
    bytes_accessed = (1 + 2 * nk) * b * n * itemsize

    # TODO(synk): for very large single-sample sequences (B < 2*sublane, huge L*C)
    # add an L-tiled grid axis with a (k-1)/2-row halo (manual DMA into the padded
    # scratch) so v7x's two TensorCores both get work.
    kern = functools.partial(_fused_decomp_kernel, kernel_sizes=kernel_sizes,
                             channels=c, max_halo=max_halo)
    outs = pl.pallas_call(
        kern,
        out_shape=out_shapes,
        grid_spec=pltpu.PrefetchScalarGridSpec(
            num_scalar_prefetch=0,
            grid=grid,
            in_specs=[io_spec],
            out_specs=out_specs,
            scratch_shapes=scratch,
        ),
        compiler_params=pltpu.CompilerParams(
            dimension_semantics=("parallel",),
            vmem_limit_bytes=vmem_limit),
        cost_estimate=pl.CostEstimate(flops=int(flops), transcendentals=0,
                                      bytes_accessed=int(bytes_accessed)),
    )(x2)

    res_list = [outs[2 * i].reshape(b, l, c) for i in range(nk)]
    mean_list = [outs[2 * i + 1].reshape(b, l, c) for i in range(nk)]
    return res_list, mean_list


def _adaptive_avg_pool_time(x, out_len):
    """PyTorch AdaptiveAvgPool1d along the time axis of (B, L, C).

    Identity when L == out_len (the standard MultiScaleDecomp configuration).
    """
    b, l, c = x.shape
    if l == out_len:
        return x
    # TODO(synk): non-identity adaptive pooling is plain JAX (einsum), not a Pallas kernel.
    idx = jnp.arange(out_len)
    starts = (idx * l) // out_len
    ends = -((-(idx + 1) * l) // out_len)  # ceil((i+1)*L/out_len)
    t = jnp.arange(l)
    w = (t[None, :] >= starts[:, None]) & (t[None, :] < ends[:, None])
    w = w.astype(jnp.float32) / (ends - starts)[:, None].astype(jnp.float32)
    out = jnp.einsum("ol,blc->boc", w, x.astype(jnp.float32))
    return out.astype(x.dtype)


def multi_scale_decomp(x, decomp_kernel_sizes, seq_len=None):
    """Forward pass of MultiScaleDecomp. Returns (seasonal_list, trend_list)."""
    _, l, _ = x.shape
    if seq_len is None:
        seq_len = l
    decomp_kernel_sizes = tuple(int(k) for k in decomp_kernel_sizes)

    if seq_len == l:
        # AdaptiveAvgPool1d(seq_len) is the identity -> fuse every scale into one
        # pallas_call (1 read + 2*nk writes of HBM instead of 3*nk passes).
        return multi_scale_series_decomp(x, decomp_kernel_sizes)

    # General path: pooling changes the length and PyTorch feeds the *pooled*
    # trend to the next scale, so scales cannot be fused across pooling.
    seasonal_list, trend_list = [], []
    for k in decomp_kernel_sizes:
        (res,), (mean,) = multi_scale_series_decomp(x, (k,))
        seasonal = _adaptive_avg_pool_time(res, seq_len)
        trend = _adaptive_avg_pool_time(mean, seq_len)
        seasonal_list.append(seasonal)
        trend_list.append(trend)
        x = trend
    return seasonal_list, trend_list


# ------------------------- pure-JAX reference (for the self-test) -------------------------

def _series_decomp_ref(x, k):
    pad = (k - 1) // 2
    l = x.shape[1]
    xf = x.astype(jnp.float32)
    xp = jnp.pad(xf, ((0, 0), (pad, pad), (0, 0)))
    acc = xp[:, 0:l, :]
    for j in range(1, k):
        acc = acc + xp[:, j:j + l, :]
    mean = acc / k
    res = xf - mean
    return res.astype(x.dtype), mean.astype(x.dtype)


def _multi_scale_ref(x, kernel_sizes, seq_len):
    s_list, t_list = [], []
    for k in kernel_sizes:
        res, mean = _series_decomp_ref(x, k)
        res = _adaptive_avg_pool_time(res, seq_len)
        mean = _adaptive_avg_pool_time(mean, seq_len)
        s_list.append(res)
        t_list.append(mean)
        x = mean
    return s_list, t_list


if __name__ == "__main__":
    # Case 1: standard configuration (seq_len == L -> identity pooling, fused kernel).
    B, L, C = 2, 16, 8
    decomp_kernel_sizes = (5, 9)
    seq_len = L

    x = jax.random.normal(jax.random.PRNGKey(0), (B, L, C), dtype=jnp.float32)
    seasonal_list, trend_list = multi_scale_decomp(x, decomp_kernel_sizes, seq_len)
    for arr in (*seasonal_list, *trend_list):
        jax.block_until_ready(arr)

    s_ref, t_ref = _multi_scale_ref(x, decomp_kernel_sizes, seq_len)
    for got, want in zip(seasonal_list + trend_list, s_ref + t_ref):
        assert got.shape == (B, seq_len, C)
        assert jnp.allclose(got, want, atol=1e-5, rtol=1e-5), \
            float(jnp.max(jnp.abs(got.astype(jnp.float32) - want.astype(jnp.float32))))

    # Case 2: non-identity adaptive pooling (general, per-scale path).
    L2, SEQ2 = 24, 16
    x2 = jax.random.normal(jax.random.PRNGKey(1), (B, L2, C), dtype=jnp.float32)
    s2, t2 = multi_scale_decomp(x2, (3, 5), seq_len=SEQ2)
    for arr in (*s2, *t2):
        jax.block_until_ready(arr)
    s2_ref, t2_ref = _multi_scale_ref(x2, (3, 5), SEQ2)
    for got, want in zip(s2 + t2, s2_ref + t2_ref):
        assert got.shape == (B, SEQ2, C)
        assert jnp.allclose(got, want, atol=1e-5, rtol=1e-5), \
            float(jnp.max(jnp.abs(got.astype(jnp.float32) - want.astype(jnp.float32))))

    print("KERNEL_OK")
</pallas_src>

<mosaic_0001>
module attributes {stable_mosaic.version = 11 : i64} {
  func.func @_fused_decomp_kernel(%arg0: i32, %arg1: memref<2x128xf32, #tpu.memory_space<vmem>>, %arg2: memref<2x128xf32, #tpu.memory_space<vmem>>, %arg3: memref<2x128xf32, #tpu.memory_space<vmem>>, %arg4: memref<2x128xf32, #tpu.memory_space<vmem>>, %arg5: memref<2x128xf32, #tpu.memory_space<vmem>>, %arg6: memref<2x192xf32, #tpu.memory_space<vmem>>) attributes {dimension_semantics = [#tpu.dimension_semantics<parallel>], iteration_bounds = array<i64: 1>, scalar_prefetch = 0 : i64, scratch_operands = 1 : i64, tpu.core_type = #tpu.core_type<tc>, window_params = [{transform_indices = @transform_0, window_bounds = array<i64: 2, 128>}, {transform_indices = @transform_1, window_bounds = array<i64: 2, 128>}, {transform_indices = @transform_2, window_bounds = array<i64: 2, 128>}, {transform_indices = @transform_3, window_bounds = array<i64: 2, 128>}, {transform_indices = @transform_4, window_bounds = array<i64: 2, 128>}]} {
    %c0 = arith.constant 0 : index
    %c0_0 = arith.constant 0 : index
    %0 = vector.load %arg1[%c0, %c0_0] : memref<2x128xf32, #tpu.memory_space<vmem>>, vector<2x128xf32>
    %cst = arith.constant 0.000000e+00 : f32
    %1 = vector.broadcast %cst : f32 to vector<2x32xf32>
    %c0_1 = arith.constant 0 : index
    %c0_2 = arith.constant 0 : index
    %2 = vector.load %arg6[%c0_1, %c0_2] : memref<2x192xf32, #tpu.memory_space<vmem>>, vector<2x32xf32>
    tpu.vector_store %arg6[%c0_1, %c0_2], %1 {strides = array<i32>} : memref<2x192xf32, #tpu.memory_space<vmem>>, vector<2x32xf32>,
    %c0_3 = arith.constant 0 : index
    %c160 = arith.constant 160 : index
    %3 = vector.load %arg6[%c0_3, %c160] : memref<2x192xf32, #tpu.memory_space<vmem>>, vector<2x32xf32>
    tpu.vector_store %arg6[%c0_3, %c160], %1 {strides = array<i32>} : memref<2x192xf32, #tpu.memory_space<vmem>>, vector<2x32xf32>,
    %c0_4 = arith.constant 0 : index
    %c32 = arith.constant 32 : index
    %4 = vector.load %arg6[%c0_4, %c32] : memref<2x192xf32, #tpu.memory_space<vmem>>, vector<2x128xf32>
    tpu.vector_store %arg6[%c0_4, %c32], %0 {strides = array<i32>} : memref<2x192xf32, #tpu.memory_space<vmem>>, vector<2x128xf32>,
    %c0_5 = arith.constant 0 : index
    %c16 = arith.constant 16 : index
    %5 = vector.load %arg6[%c0_5, %c16] : memref<2x192xf32, #tpu.memory_space<vmem>>, vector<2x160xf32>
    %6 = vector.extract_strided_slice %5 {offsets = [0, 0], sizes = [2, 152], strides = [1, 1]} : vector<2x160xf32> to vector<2x152xf32>
    %7 = vector.extract_strided_slice %5 {offsets = [0, 8], sizes = [2, 152], strides = [1, 1]} : vector<2x160xf32> to vector<2x152xf32>
    %8 = arith.addf %6, %7 : vector<2x152xf32>
    %9 = vector.extract_strided_slice %8 {offsets = [0, 0], sizes = [2, 136], strides = [1, 1]} : vector<2x152xf32> to vector<2x136xf32>
    %10 = vector.extract_strided_slice %8 {offsets = [0, 16], sizes = [2, 136], strides = [1, 1]} : vector<2x152xf32> to vector<2x136xf32>
    %11 = arith.addf %9, %10 : vector<2x136xf32>
    %12 = vector.extract_strided_slice %5 {offsets = [0, 0], sizes = [2, 128], strides = [1, 1]} : vector<2x160xf32> to vector<2x128xf32>
    %13 = vector.extract_strided_slice %11 {offsets = [0, 8], sizes = [2, 128], strides = [1, 1]} : vector<2x136xf32> to vector<2x128xf32>
    %14 = arith.addf %12, %13 : vector<2x128xf32>
    %cst_6 = arith.constant 2.000000e-01 : f32
    %15 = vector.broadcast %cst_6 : f32 to vector<2x128xf32>
    %16 = arith.mulf %14, %15 : vector<2x128xf32>
    %17 = arith.subf %0, %16 : vector<2x128xf32>
    %c0_7 = arith.constant 0 : index
    %c0_8 = arith.constant 0 : index
    %18 = vector.load %arg2[%c0_7, %c0_8] : memref<2x128xf32, #tpu.memory_space<vmem>>, vector<2x128xf32>
    tpu.vector_store %arg2[%c0_7, %c0_8], %17 {strides = array<i32>} : memref<2x128xf32, #tpu.memory_space<vmem>>, vector<2x128xf32>,
    %c0_9 = arith.constant 0 : index
    %c0_10 = arith.constant 0 : index
    %19 = vector.load %arg3[%c0_9, %c0_10] : memref<2x128xf32, #tpu.memory_space<vmem>>, vector<2x128xf32>
    tpu.vector_store %arg3[%c0_9, %c0_10], %16 {strides = array<i32>} : memref<2x128xf32, #tpu.memory_space<vmem>>, vector<2x128xf32>,
    %c0_11 = arith.constant 0 : index
    %c32_12 = arith.constant 32 : index
    %20 = vector.load %arg6[%c0_11, %c32_12] : memref<2x192xf32, #tpu.memory_space<vmem>>, vector<2x128xf32>
    tpu.vector_store %arg6[%c0_11, %c32_12], %16 {strides = array<i32>} : memref<2x192xf32, #tpu.memory_space<vmem>>, vector<2x128xf32>,
    %c0_13 = arith.constant 0 : index
    %c0_14 = arith.constant 0 : index
    %21 = vector.load %arg6[%c0_13, %c0_14] : memref<2x192xf32, #tpu.memory_space<vmem>>, vector<2x192xf32>
    %22 = vector.extract_strided_slice %21 {offsets = [0, 0], sizes = [2, 184], strides = [1, 1]} : vector<2x192xf32> to vector<2x184xf32>
    %23 = vector.extract_strided_slice %21 {offsets = [0, 8], sizes = [2, 184], strides = [1, 1]} : vector<2x192xf32> to vector<2x184xf32>
    %24 = arith.addf %22, %23 : vector<2x184xf32>
    %25 = vector.extract_strided_slice %24 {offsets = [0, 0], sizes = [2, 168], strides = [1, 1]} : vector<2x184xf32> to vector<2x168xf32>
    %26 = vector.extract_strided_slice %24 {offsets = [0, 16], sizes = [2, 168], strides = [1, 1]} : vector<2x184xf32> to vector<2x168xf32>
    %27 = arith.addf %25, %26 : vector<2x168xf32>
    %28 = vector.extract_strided_slice %27 {offsets = [0, 0], sizes = [2, 136], strides = [1, 1]} : vector<2x168xf32> to vector<2x136xf32>
    %29 = vector.extract_strided_slice %27 {offsets = [0, 32], sizes = [2, 136], strides = [1, 1]} : vector<2x168xf32> to vector<2x136xf32>
    %30 = arith.addf %28, %29 : vector<2x136xf32>
    %31 = vector.extract_strided_slice %21 {offsets = [0, 0], sizes = [2, 128], strides = [1, 1]} : vector<2x192xf32> to vector<2x128xf32>
    %32 = vector.extract_strided_slice %30 {offsets = [0, 8], sizes = [2, 128], strides = [1, 1]} : vector<2x136xf32> to vector<2x128xf32>
    %33 = arith.addf %31, %32 : vector<2x128xf32>
    %cst_15 = arith.constant 0.111111112 : f32
    %34 = vector.broadcast %cst_15 : f32 to vector<2x128xf32>
    %35 = arith.mulf %33, %34 : vector<2x128xf32>
    %36 = arith.subf %16, %35 : vector<2x128xf32>
    %c0_16 = arith.constant 0 : index
    %c0_17 = arith.constant 0 : index
    %37 = vector.load %arg4[%c0_16, %c0_17] : memref<2x128xf32, #tpu.memory_space<vmem>>, vector<2x128xf32>
    tpu.vector_store %arg4[%c0_16, %c0_17], %36 {strides = array<i32>} : memref<2x128xf32, #tpu.memory_space<vmem>>, vector<2x128xf32>,
    %c0_18 = arith.constant 0 : index
    %c0_19 = arith.constant 0 : index
    %38 = vector.load %arg5[%c0_18, %c0_19] : memref<2x128xf32, #tpu.memory_space<vmem>>, vector<2x128xf32>
    tpu.vector_store %arg5[%c0_18, %c0_19], %35 {strides = array<i32>} : memref<2x128xf32, #tpu.memory_space<vmem>>, vector<2x128xf32>,
    return
  }
  func.func @transform_0(%arg0: i32) -> (i32, i32) {
    %c0_i32 = arith.constant 0 : i32
    %c0_i32_0 = arith.constant 0 : i32
    return %arg0, %c0_i32 : i32, i32
  }
  func.func @transform_1(%arg0: i32) -> (i32, i32) {
    %c0_i32 = arith.constant 0 : i32
    %c0_i32_0 = arith.constant 0 : i32
    return %arg0, %c0_i32 : i32, i32
  }
  func.func @transform_2(%arg0: i32) -> (i32, i32) {
    %c0_i32 = arith.constant 0 : i32
    %c0_i32_0 = arith.constant 0 : i32
    return %arg0, %c0_i32 : i32, i32
  }
  func.func @transform_3(%arg0: i32) -> (i32, i32) {
    %c0_i32 = arith.constant 0 : i32
    %c0_i32_0 = arith.constant 0 : i32
    return %arg0, %c0_i32 : i32, i32
  }
  func.func @transform_4(%arg0: i32) -> (i32, i32) {
    %c0_i32 = arith.constant 0 : i32
    %c0_i32_0 = arith.constant 0 : i32
    return %arg0, %c0_i32 : i32, i32
  }
}

</mosaic_0001>

<bundles_post_ra>
// kernel: tpu_custom_call.1
= control target key start
LH: loop header
LB: loop body
LE: loop exit
PB: predicated region body
PF: predicated region fallthrough
CT: control target
= control target key end

     0   :  { %10 = vsyncpa [#allocation4], 0  ;;  %s489_s0 = inlined_call_operand.hbm [shape: f32[2,128], index: 0, kind: input, shape index: {}]   ;;  %s490_s1 = inlined_call_operand.hbm [shape: f32[2,128], index: 1, kind: output, shape index: {0}]   ;;  %s491_s2 = inlined_call_operand.hbm [shape: f32[2,128], index: 2, kind: output, shape index: {1}]   ;;  %s492_s3 = inlined_call_operand.hbm [shape: f32[2,128], index: 3, kind: output, shape index: {2}]   ;;  %s493_s4 = inlined_call_operand.hbm [shape: f32[2,128], index: 4, kind: output, shape index: {3}]  }
   0x1   :  { %11 = vsyncpa [#allocation5], 0 }
   0x2   :  { %12 = vsyncpa [#allocation8], 0 }
   0x3   :  { %13 = vsyncpa [#allocation11], 0  ;;  %s341_s15 = smov [#allocation3]   ;;  %s223_s19 = scalar_lea.hbm %s489_s0, 32 }
   0x4   :  { %s20_s16 = sshll.u32 %s341_s15, 4  ;;  %p224_p0 = scmp.ne.s32.totalorder %s489_s0, %s223_s19  ;;  %s21_s16 = int_to_ptr.vmem [resolvable:$true] %s20_s16 }
   0x5   :  { %p227_p1 = scmp.lt.u32.totalorder %s223_s19, %s489_s0 }
   0x7   :  { %p229_p2 = pnand %p227_p1, %p224_p0 }
   0x9   :  { %232 = shalt.err (!%p229_p2)
}
   0xa   :  { %s233_s24 = scalar_lea.vmem %s21_s16, 32  ;;  %p238_p4 = scmp.lt.s32.totalorder %s21_s16, %s21_s16 }
   0xb   :  { %p234_p3 = scmp.ne.s32.totalorder %s21_s16, %s233_s24  ;;  %p239_p5 = scmp.lt.s32.totalorder %s233_s24, %s233_s24 }
   0xd   :  { %p240_p6 = por %p239_p5, %p238_p4 }
   0xf   :  { %p241_p7 = pnand %p240_p6, %p234_p3 }
  0x11   :  { %244 = shalt.err (!%p241_p7)
}
  0x12   :  { %23 = dma.hbm_to_vmem [thread:$0]  %s489_s0, 32, %s21_s16, [#allocation4]  }
  0x13   :  { %333 = dma.done.wait [#allocation4], 32  }
  0x14   :  { %334 = vsyncadd [#allocation4], 4294967264  ;;  %v36_v0 = vlaneseq  ;;  %vm28_vm0 = vcmask 254976   ;;  %v342_v1 = vmov 1983009808   ;;  %vm30_vm1 = vcmask 517376  }
  0x15   :  { %v34_v2 = vunpack.c.l.s4 %v342_v1  ;;  %v343_v4 = vmov 0.0   ;;  %v392_v7 = vld [vmem:[#allocation3] sm:$0x3]  ;;  %s344_s0 = smov 32   ;;  %vm46_vm2 = vcmask 1041664   ;;  %vm47_vm3 = vcmask 257026  }
  0x16   :  { %v37_v3 = vshrl.u32 %v36_v0, 7  ;;  %29 = vst.msk [vmem:[#allocation2] sm:$0x3] %vm28_vm0, %v343_v4  ;;  %vm43_vm4 = vcmask 261120   ;;  %vm396_vm5 = vmor %vm47_vm3, %vm46_vm2  ;;  %s345_s27 = smov 120   ;;  %vm55_vm6 = vcmask 982016  }
  0x17   :  { %31 = vst.msk [vmem:[#allocation2 + $0x2] sm:$0x3] %vm30_vm1, %v343_v4  ;;  %v35_v5 = vunpack.c.0.s8 %v34_v2  ;;  %s346_s28 = smov 112   ;;  %vm63_vm7 = vcmask 916480   ;;  %s347_s29 = smov 16   ;;  %vm96_vm8 = vcmask 130048  }
  0x18   :  { %s348_s30 = smov 96   ;;  %vm119_vm9 = vcmask 785408   ;;  %s349_s5 = smov [#allocation10]  }
  0x19   :  { %v390_v6 = vsub.s32 %v35_v5, %v37_v3  ;;  %s191_s6 = sshll.u32 %s349_s5, 4  ;;  %s350_s7 = smov [#allocation7]   ;;  %s192_s6 = int_to_ptr.vmem [resolvable:$true] %s191_s6 }
  0x1a   :  { %s171_s8 = sshll.u32 %s350_s7, 4  ;;  %s245_s9 = scalar_lea.vmem %s192_s6, 32  ;;  %s172_s8 = int_to_ptr.vmem [resolvable:$true] %s171_s8 }
  0x1b   :  { %v39_v8 = vrot.slane %v392_v7, %v390_v6  ;;  %p246_p8 = scmp.ne.s32.totalorder %s192_s6, %s245_s9  ;;  %p250_p9 = scmp.lt.s32.totalorder %s192_s6, %s192_s6 }
  0x1c   :  { %p251_p10 = scmp.lt.s32.totalorder %s245_s9, %s245_s9 }
  0x1d   :  { %40 = vrot.lane.b32.xlu0 %v39_v8, %s344_s0 }
  0x1e   :  { %p252_p11 = por %p251_p10, %p250_p9 }
  0x20   :  { %p253_p12 = pnand %p252_p11, %p246_p8 }
  0x8f   :  { %v41_v9 = vpop.permute.xlu0 %40 }
  0x90   :  { %v42_v11 = vrot.slane %v41_v9, 6 }
  0x92   :  { %v44_v12 = vsel %vm43_vm4, %v42_v11, %v41_v9 }
  0x93   :  { %49 = vst.msk [vmem:[#allocation2] sm:$0xf] %vm396_vm5, %v44_v12 }
  0x9a   :  { %v50_v13 = vld [vmem:[#allocation2] sm:$0xf] }
  0x9b   :  { %52 = vrot.lane.b32.xlu0 %v50_v13, %s345_s27 }
 0x10d   :  { %v53_v14 = vpop.permute.xlu0 %52 }
 0x10e   :  { %v54_v15 = vrot.slane %v53_v14, 2 }
 0x110   :  { %v56_v16 = vsel %vm55_vm6, %v53_v14, %v54_v15 }
 0x111   :  { %v58_v17 = vadd.f32 %v56_v16, %v50_v13 }
 0x113   :  { %60 = vrot.lane.b32.xlu1 %v58_v17, %s346_s28 }
 0x185   :  { %v61_v18 = vpop.permute.xlu1 %60 }
 0x186   :  { %v62_v19 = vrot.slane %v61_v18, 2 }
 0x188   :  { %v64_v20 = vsel %vm63_vm7, %v61_v18, %v62_v19 }
 0x189   :  { %v66_v21 = vadd.f32 %v64_v20, %v58_v17 }
 0x18b   :  { %68 = vrot.lane.b32.xlu1 %v66_v21, %s345_s27 }
 0x1fd   :  { %v69_v22 = vpop.permute.xlu1 %68 }
 0x1fe   :  { %v70_v23 = vrot.slane %v69_v22, 2 }
 0x200   :  { %v71_v24 = vsel %vm55_vm6, %v69_v22, %v70_v23 }
 0x201   :  { %v73_v25 = vadd.f32 %v71_v24, %v50_v13 }
 0x203   :  { %v408_v26 = vmul.f32 0.2, %v73_v25 }
 0x205   :  { %93 = vrot.lane.b32.xlu0 %v408_v26, %s347_s29  ;;  %v82_v43 = vrot.slane %v408_v26, %v390_v6 }
 0x207   :  { %v83_v49 = vcombine.high %v82_v43, %v82_v43 }
 0x277   :  { %v94_v27 = vpop.permute.xlu0 %93 }
 0x278   :  { %v95_v28 = vrot.slane %v94_v27, 6 }
 0x27a   :  { %v97_v29 = vsel %vm96_vm8, %v95_v28, %v94_v27 }
 0x27b   :  { %99 = vst.msk [vmem:[#allocation2] sm:$0xf] %vm396_vm5, %v97_v29 }
 0x282   :  { %v100_v30 = vld [vmem:[#allocation2] sm:$0xf] }
 0x283   :  { %102 = vrot.lane.b32.xlu1 %v100_v30, %s345_s27 }
 0x2f5   :  { %v103_v31 = vpop.permute.xlu1 %102 }
 0x2f6   :  { %v104_v32 = vrot.slane %v103_v31, 2 }
 0x2f8   :  { %v105_v33 = vsel %vm55_vm6, %v103_v31, %v104_v32 }
 0x2f9   :  { %v107_v34 = vadd.f32 %v105_v33, %v100_v30 }
 0x2fb   :  { %109 = vrot.lane.b32.xlu0 %v107_v34, %s346_s28 }
 0x36d   :  { %v110_v35 = vpop.permute.xlu0 %109 }
 0x36e   :  { %v111_v36 = vrot.slane %v110_v35, 2 }
 0x370   :  { %v112_v37 = vsel %vm63_vm7, %v110_v35, %v111_v36 }
 0x371   :  { %v114_v38 = vadd.f32 %v112_v37, %v107_v34 }
 0x373   :  { %116 = vrot.lane.b32.xlu1 %v114_v38, %s348_s30 }
 0x3e5   :  { %v117_v39 = vpop.permute.xlu1 %116 }
 0x3e6   :  { %v118_v40 = vrot.slane %v117_v39, 2 }
 0x3e8   :  { %v120_v41 = vsel %vm119_vm9, %v117_v39, %v118_v40 }
 0x3e9   :  { %v122_v42 = vadd.f32 %v120_v41, %v114_v38 }
 0x3eb   :  { %124 = vrot.lane.b32.xlu0 %v122_v42, %s345_s27 }
 0x3ef   :  { %84 = vrot.lane.b32.xlu0 %v82_v43, %s346_s28 }
 0x45d   :  { %v125_v44 = vpop.permute.xlu0 %124 }
 0x45e   :  { %v126_v45 = vrot.slane %v125_v44, 2 }
 0x460   :  { %v127_v46 = vsel %vm55_vm6, %v125_v44, %v126_v45 }
 0x461   :  { %v129_v47 = vadd.f32 %v127_v46, %v100_v30 }
 0x463   :  { %v130_v48 = vmul.f32 0.11111111, %v129_v47 }
 0x465   :  { %154 = vst [vmem:[#allocation10] sm:$0x3] %v130_v48  ;;  %132 = vrot.lane.b32.xlu1 %v130_v48, %s347_s29 }
 0x469   :  { %86 = vrot.lane.b32.xlu1 %v83_v49, %s346_s28 }
 0x4d7   :  { %v133_v50 = vpop.permute.xlu1 %132 }
 0x4d8   :  { %v134_v51 = vrot.slane %v133_v50, 6 }
 0x4d9   :  { %256 = shalt.err (!%p253_p12)
}
 0x4da   :  { %s257_s12 = scalar_lea.hbm %s493_s4, 32 }
 0x4db   :  { %p258_p13 = scmp.ne.s32.totalorder %s493_s4, %s257_s12  ;;  %p261_p0 = scmp.lt.u32.totalorder %s257_s12, %s493_s4 }
 0x4dd   :  { %p263_p1 = pnand %p261_p0, %p258_p13 }
 0x4df   :  { %266 = shalt.err (!%p263_p1)
}
 0x4e0   :  { %194 = dma.vmem_to_hbm [thread:$0]  %s192_s6, 32, %s493_s4, [#allocation11]   ;;  %v135_v52 = vsel %vm96_vm8, %v134_v51, %v133_v50  ;;  %v85_v53 = vpop.permute.xlu0 %84  ;;  %v87_v55 = vpop.permute.xlu1 %86 }
 0x4e1   :  { %s351_s19 = smov [#allocation6]   ;;  %v137_v54 = vsub.f32 %v408_v26, %v135_v52  ;;  %v88_v56 = vsel %vm63_vm7, %v85_v53, %v87_v55  ;;  %s267_s21 = scalar_lea.vmem %s172_s8, 32 }
 0x4e2   :  { %s161_s20 = sshll.u32 %s351_s19, 4  ;;  %v90_v57 = vsub.f32 %v392_v7, %v88_v56  ;;  %92 = vst [vmem:[#allocation7] sm:$0x3] %v88_v56  ;;  %p268_p2 = scmp.ne.s32.totalorder %s172_s8, %s267_s21  ;;  %s443_s20 = int_to_ptr.vmem [resolvable:$true] %s161_s20 }
 0x4e3   :  { %v145_v58 = vrot.slane %v137_v54, %v390_v6  ;;  %p272_p3 = scmp.lt.s32.totalorder %s172_s8, %s172_s8  ;;  %p273_p4 = scmp.lt.s32.totalorder %s267_s21, %s267_s21 }
 0x4e5   :  { %p274_p5 = por %p273_p4, %p272_p3 }
 0x4e7   :  { %p275_p6 = pnand %p274_p5, %p268_p2 }
 0x4e9   :  { %278 = shalt.err (!%p275_p6)
}
 0x4ea   :  { %s279_s23 = scalar_lea.hbm %s491_s2, 32 }
 0x4eb   :  { %p280_p7 = scmp.ne.s32.totalorder %s491_s2, %s279_s23  ;;  %p283_p8 = scmp.lt.u32.totalorder %s279_s23, %s491_s2 }
 0x4ed   :  { %p285_p9 = pnand %p283_p8, %p280_p7 }
 0x4ef   :  { %288 = shalt.err (!%p285_p9)
}
 0x4f0   :  { %174 = dma.vmem_to_hbm [thread:$0]  %s172_s8, 32, %s491_s2, [#allocation8]   ;;  %91 = vst [vmem:[#allocation6] sm:$0x3] %v90_v57  ;;  %147 = vrot.lane.b32.xlu0 %v145_v58, %s346_s28  ;;  %v146_v59 = vcombine.high %v145_v58, %v145_v58 }
 0x4f1   :  { %s289_s30 = scalar_lea.vmem %s443_s20, 32  ;;  %p294_p11 = scmp.lt.s32.totalorder %s443_s20, %s443_s20 }
 0x4f2   :  { %p290_p10 = scmp.ne.s32.totalorder %s443_s20, %s289_s30  ;;  %p295_p12 = scmp.lt.s32.totalorder %s289_s30, %s289_s30 }
 0x4f4   :  { %p296_p13 = por %p295_p12, %p294_p11 }
 0x4f6   :  { %p297_p0 = pnand %p296_p13, %p290_p10 }
 0x4f8   :  { %300 = shalt.err (!%p297_p0)
}
 0x4f9   :  { %s301_s7 = scalar_lea.hbm %s490_s1, 32 }
 0x4fa   :  { %p302_p1 = scmp.ne.s32.totalorder %s490_s1, %s301_s7  ;;  %p305_p2 = scmp.lt.u32.totalorder %s301_s7, %s490_s1 }
 0x4fc   :  { %p307_p3 = pnand %p305_p2, %p302_p1 }
 0x4fe   :  { %310 = shalt.err (!%p307_p3)
}
 0x4ff   :  { %164 = dma.vmem_to_hbm [thread:$0]  %s443_s20, 32, %s490_s1, [#allocation5]   ;;  %149 = vrot.lane.b32.xlu1 %v146_v59, %s346_s28 }
 0x500   :  { %s352_s13 = smov [#allocation9]  }
 0x501   :  { %s181_s14 = sshll.u32 %s352_s13, 4  ;;  %s182_s14 = int_to_ptr.vmem [resolvable:$true] %s181_s14 }
 0x502   :  { %s311_s15 = scalar_lea.vmem %s182_s14, 32  ;;  %p316_p5 = scmp.lt.s32.totalorder %s182_s14, %s182_s14 }
 0x503   :  { %p312_p4 = scmp.ne.s32.totalorder %s182_s14, %s311_s15  ;;  %p317_p6 = scmp.lt.s32.totalorder %s311_s15, %s311_s15 }
 0x505   :  { %p318_p7 = por %p317_p6, %p316_p5 }
 0x507   :  { %p319_p8 = pnand %p318_p7, %p312_p4 }
 0x562   :  { %v148_v60 = vpop.permute.xlu0 %147 }
 0x571   :  { %v150_v61 = vpop.permute.xlu1 %149 }
 0x572   :  { %v151_v62 = vsel %vm63_vm7, %v148_v60, %v150_v61 }
 0x573   :  { %153 = vst [vmem:[#allocation9] sm:$0x3] %v151_v62 }
 0x574   :  { %322 = shalt.err (!%p319_p8)
}
 0x575   :  { %s323_s1 = scalar_lea.hbm %s492_s3, 32 }
 0x576   :  { %p324_p9 = scmp.ne.s32.totalorder %s492_s3, %s323_s1  ;;  %p327_p10 = scmp.lt.u32.totalorder %s323_s1, %s492_s3 }
 0x578   :  { %p329_p11 = pnand %p327_p10, %p324_p9 }
 0x57a   :  { %332 = shalt.err (!%p329_p11)
}
 0x57b   :  { %184 = dma.vmem_to_hbm [thread:$0]  %s182_s14, 32, %s492_s3, [#allocation8]  }
 0x57c   :  { %335 = dma.done.wait [#allocation5], 32  }
 0x57d   :  { %336 = vsyncadd [#allocation5], 4294967264 }
 0x57e   :  { %337 = dma.done.wait [#allocation8], 64  }
 0x57f   :  { %338 = vsyncadd [#allocation8], 4294967232 }
 0x580   :  { %339 = dma.done.wait [#allocation11], 32  }
 0x581   :  { %340 = vsyncadd [#allocation11], 4294967264 }
 0x582   :  { %207 = vsyncpa [#allocation4], 1 }
 0x583   :  { %208 = vsyncpa [#allocation5], 1 }
 0x584   :  { %209 = vsyncpa [#allocation8], 1 }
 0x585   :  { %210 = vsyncpa [#allocation11], 1 }

</bundles_post_ra>
